<compile_context>
chip_gen: v6e
topology: v6e:2x2x1
jax: 0.10.0
libtpu: 0.0.40
codegen_flags: <defaults>
</compile_context>

<pallas_src>
import jax
import jax.numpy as jnp
from jax.experimental import pallas as pl
from jax.experimental.pallas import tpu as pltpu

_LANE = 128
_PAD_LOGIT = -1.0e4   # exp(-1e4) == 0.0 in f32 (also after bf16 rounding to -9984)


def _cdiv(a: int, b: int) -> int:
    return -(-a // b)


def _round_up(a: int, b: int) -> int:
    return _cdiv(a, b) * b


def _round_down(a: int, b: int) -> int:
    return (a // b) * b


def _vmem_capacity_bytes() -> int:
    try:
        return int(pltpu.get_tpu_info().vmem_capacity_bytes)
    except Exception:  # conservative fallback (v7x per-TC VMEM)
        return 64 * 1024 * 1024


def _num_tensorcores() -> int:
    """TensorCores per Pallas device: 2 on v4/v5p (megacore) and v7x, else 1."""
    try:
        kind = jax.devices()[0].device_kind.lower()
    except Exception:
        return 1
    if any(t in kind for t in ("v2", "v3", "v5 lite", "v5e", "v6")):
        return 1
    if any(t in kind for t in ("v4", "v5p", "v5", "v7", "7x")):
        return 2
    return 1


def _sublane_quantum(dtype) -> int:
    # 8 rows per vreg at 4 B/elem, 16 at 2 B, 32 at 1 B.
    return 8 * max(1, 4 // jnp.dtype(dtype).itemsize)


def combined_loss(logits, targets, smooth_factor: float = 1.0):
    """0.5 * BCEWithLogitsLoss(reduction='mean') + SoftDiceLoss(smooth_factor).

    Inputs are NCHW (any trailing shape).  `targets` may be f32 / bf16 / int8 /
    bool; narrow dtypes are streamed as-is and cast to f32 inside the kernel.
    """
    n = logits.shape[0]
    m = 1
    for d in logits.shape[1:]:
        m *= d

    x = logits.reshape(n, m)
    t = targets.reshape(n, m)
    isx = jnp.dtype(x.dtype).itemsize
    ist = jnp.dtype(t.dtype).itemsize
    sub = max(_sublane_quantum(x.dtype), _sublane_quantum(t.dtype))

    # Minimal lane padding: only when M is not already a multiple of 128 lanes
    # (or smaller than a single sub x 128 tile).  Aligned shapes are zero-copy.
    m_pad = max(_round_up(m, _LANE), sub * _LANE)
    if m_pad != m:
        x = jnp.pad(x, ((0, 0), (0, m_pad - m)), constant_values=_PAD_LOGIT)
        t = jnp.pad(t, ((0, 0), (0, m_pad - m)), constant_values=0)
    rows = m_pad // _LANE

    x3 = x.reshape(n, rows, _LANE)   # free reshape (contiguous)
    t3 = t.reshape(n, rows, _LANE)

    # ---------------- tiling (VMEM-budget & generation aware) ----------------
    vmem_cap = _vmem_capacity_bytes()
    # DMA footprint = 2 inputs x 2 pipeline buffers, budgeted at half of VMEM;
    # the other half is headroom for compute temporaries, scratch, misc.
    # TODO(synk): very large batch sizes (n * sub * 128 * itemsize * 4 > VMEM/2)
    # would need an extra batch-tiled grid axis; not needed for typical N.
    r_cap = vmem_cap // (4 * n * _LANE * (isx + ist))
    r_cap = max(sub, _round_down(r_cap, sub))
    r_tile = min(r_cap, max(sub, _round_down(rows, sub)))

    # Inner compute sub-chunk: bounds the live f32 elementwise temporaries
    # (x, t, e, bce, r, p, p*t, ...) to a few MiB independent of r_tile.
    chunk = (512 * 1024) // (n * _LANE * 4)
    chunk = max(sub, min(_round_down(chunk, sub), 1024, r_tile))
    r_tile = _round_down(r_tile, chunk)
    n_chunks = r_tile // chunk

    total_tiles = _cdiv(rows, r_tile)

    # Shard the reduction over TensorCores only on chips that actually have 2.
    n_splits = 2 if (_num_tensorcores() >= 2 and total_tiles >= 2) else 1
    tiles_per_split = _cdiv(total_tiles, n_splits)

    dma_bytes = 2 * n * r_tile * _LANE * (isx + ist)
    temp_bytes = 10 * n * chunk * _LANE * 4
    vmem_limit = int(min(vmem_cap, max(32 << 20, dma_bytes + temp_bytes + (8 << 20))))

    # ------------------------------- kernel ----------------------------------
    def kernel(x_ref, t_ref, out_ref, acc_ref):
        s = pl.program_id(0)
        k = pl.program_id(1)

        @pl.when(k == 0)
        def _init():
            acc_ref[...] = jnp.zeros_like(acc_ref)

        # Valid rows left in this tile.  < r_tile only for the ragged final
        # tile; <= 0 for the clamped overflow tiles of an uneven 2-core split.
        rem = rows - (s * tiles_per_split + k) * r_tile

        def accumulate(masked):
            ridx = (jax.lax.broadcasted_iota(jnp.int32, (1, chunk, 1), 1)
                    if masked else None)   # hoisted out of the chunk loop

            def step(off):
                xv = x_ref[:, pl.ds(off, chunk), :].astype(jnp.float32)
                tv = t_ref[:, pl.ds(off, chunk), :].astype(jnp.float32)
                if masked:
                    keep = ridx < (rem - off)
                    xv = jnp.where(keep, xv, _PAD_LOGIT)
                    tv = jnp.where(keep, tv, 0.0)
                # One exp per element feeds both the numerically stable BCE
                # term and the sigmoid; the divide goes to the EUP slot.
                e = jnp.exp(-jnp.abs(xv))
                bce = jnp.maximum(xv, 0.0) - xv * tv + jnp.log1p(e)
                r = pl.reciprocal(1.0 + e, approx=True)     # sigmoid(|x|)
                p = jnp.where(xv >= 0.0, r, e * r)           # sigmoid(x)
                acc_ref[0] += jnp.sum(bce, axis=1)
                acc_ref[1] += jnp.sum(p * tv, axis=1)
                acc_ref[2] += jnp.sum(p, axis=1)
                acc_ref[3] += jnp.sum(tv, axis=1)

            if n_chunks == 1:
                step(0)
            else:
                def body(j, carry):
                    step(pl.multiple_of(j * chunk, chunk))
                    return carry
                jax.lax.fori_loop(0, n_chunks, body, 0)

        @pl.when(rem >= r_tile)          # full tile: no per-row masking cost
        def _full():
            accumulate(masked=False)

        @pl.when(rem < r_tile)           # ragged / overflow tile: mask rows
        def _ragged():
            accumulate(masked=True)

        @pl.when(k == pl.num_programs(1) - 1)
        def _finalize():
            # Cross-lane reduce + pack the (n, 4) result once per split.
            col = jax.lax.broadcasted_iota(jnp.int32, (1, 4), 1)
            sums = [jnp.sum(acc_ref[i], axis=1, keepdims=True) for i in range(4)]
            packed = (jnp.where(col == 0, sums[0], 0.0)
                      + jnp.where(col == 1, sums[1], 0.0)
                      + jnp.where(col == 2, sums[2], 0.0)
                      + jnp.where(col == 3, sums[3], 0.0))   # (n, 4)
            out_ref[...] = packed[None]                       # (1, n, 4)

    if n_splits * tiles_per_split == total_tiles:
        def in_map(s, k):
            return (0, s * tiles_per_split + k, 0)
    else:
        def in_map(s, k):
            # Clamp the (at most one) overflow tile of an uneven split; its
            # rows are fully masked in-kernel so it contributes zero.
            return (0, jnp.minimum(s * tiles_per_split + k, total_tiles - 1), 0)

    partials = pl.pallas_call(
        kernel,
        out_shape=jax.ShapeDtypeStruct((n_splits, n, 4), jnp.float32),
        grid_spec=pltpu.PrefetchScalarGridSpec(
            num_scalar_prefetch=0,
            grid=(n_splits, tiles_per_split),
            in_specs=[
                pl.BlockSpec((n, r_tile, _LANE), in_map),
                pl.BlockSpec((n, r_tile, _LANE), in_map),
            ],
            out_specs=pl.BlockSpec((1, n, 4), lambda s, k: (s, 0, 0)),
            scratch_shapes=[pltpu.VMEM((4, n, _LANE), jnp.float32)],
        ),
        compiler_params=pltpu.CompilerParams(
            dimension_semantics=("parallel", "arbitrary"),
            vmem_limit_bytes=vmem_limit,
        ),
    )(x3, t3)

    parts = jnp.sum(partials, axis=0)          # combine per-core partials: (n, 4)
    bce_sum, inter, proba_sum, target_sum = (parts[:, 0], parts[:, 1],
                                             parts[:, 2], parts[:, 3])

    # BCEWithLogitsLoss(reduction='mean') over the flattened (un-padded) input.
    bce_mean = jnp.sum(bce_sum) / (n * m)

    # SoftDiceLoss.
    score = (2.0 * inter + smooth_factor) / (proba_sum + target_sum + smooth_factor)
    dice = 1.0 - jnp.sum(score) / n

    return 0.5 * bce_mean + dice


def _reference_loss(logits, targets, smooth_factor: float = 1.0):
    # Pure-JAX reference mirroring the PyTorch module.
    x = logits.reshape(-1).astype(jnp.float32)
    t = targets.reshape(-1).astype(jnp.float32)
    bce = jnp.mean(jnp.maximum(x, 0.0) - x * t + jnp.log1p(jnp.exp(-jnp.abs(x))))

    n = logits.shape[0]
    p = jax.nn.sigmoid(logits.astype(jnp.float32)).reshape(n, -1)
    tg = targets.astype(jnp.float32).reshape(n, -1)
    inter = jnp.sum(p * tg, axis=1)
    score = (2.0 * inter + smooth_factor) / (
        jnp.sum(p, axis=1) + jnp.sum(tg, axis=1) + smooth_factor)
    dice = 1.0 - jnp.sum(score) / n
    return 0.5 * bce + dice


if __name__ == "__main__":
    key = jax.random.PRNGKey(0)
    keys = jax.random.split(key, 8)

    # pl.reciprocal(approx=True) trades a small amount of precision for an EUP
    # slot; tolerance accordingly loosened from 1e-5.
    TOL = dict(rtol=5e-3, atol=5e-3)

    # 1) Main NCHW case (M % 128 == 0 -> zero-copy path).
    N, C, H, W = 2, 4, 16, 16
    logits = jax.random.normal(keys[0], (N, C, H, W), dtype=jnp.float32)
    targets = (jax.random.uniform(keys[1], (N, C, H, W)) > 0.5).astype(jnp.float32)
    loss = jax.block_until_ready(combined_loss(logits, targets))
    ref = jax.block_until_ready(_reference_loss(logits, targets))
    assert jnp.allclose(loss, ref, **TOL), (loss, ref)

    # 2) Ragged case (M % 128 != 0): minimal lane pad with -1e4/0 values.
    logits2 = jax.random.normal(keys[2], (2, 3, 15, 17), dtype=jnp.float32)
    targets2 = (jax.random.uniform(keys[3], (2, 3, 15, 17)) > 0.5).astype(jnp.float32)
    loss2 = jax.block_until_ready(combined_loss(logits2, targets2))
    ref2 = jax.block_until_ready(_reference_loss(logits2, targets2))
    assert jnp.allclose(loss2, ref2, **TOL), (loss2, ref2)

    # 3) Aligned lanes but ragged row tiling (rows=15): in-kernel row mask path.
    logits3 = jax.random.normal(keys[4], (2, 3, 40, 16), dtype=jnp.float32)
    targets3 = (jax.random.uniform(keys[5], (2, 3, 40, 16)) > 0.5).astype(jnp.float32)
    loss3 = jax.block_until_ready(combined_loss(logits3, targets3))
    ref3 = jax.block_until_ready(_reference_loss(logits3, targets3))
    assert jnp.allclose(loss3, ref3, **TOL), (loss3, ref3)

    # 4) bf16 inputs: dtype-aware 16-row sublane quantum, halved HBM traffic.
    logits4 = jax.random.normal(keys[6], (2, 4, 32, 16), dtype=jnp.bfloat16)
    targets4 = (jax.random.uniform(keys[7], (2, 4, 32, 16)) > 0.5).astype(jnp.bfloat16)
    loss4 = jax.block_until_ready(combined_loss(logits4, targets4))
    ref4 = jax.block_until_ready(_reference_loss(logits4, targets4))
    assert jnp.allclose(loss4, ref4, **TOL), (loss4, ref4)

    print("KERNEL_OK")
</pallas_src>

<mosaic_0001>
module attributes {stable_mosaic.version = 11 : i64} {
  func.func @kernel(%arg0: i32, %arg1: i32, %arg2: memref<2x8x128xf32, #tpu.memory_space<vmem>>, %arg3: memref<2x8x128xf32, #tpu.memory_space<vmem>>, %arg4: memref<1x2x4xf32, #tpu.memory_space<vmem>>, %arg5: memref<4x2x128xf32, #tpu.memory_space<vmem>>) attributes {dimension_semantics = [#tpu.dimension_semantics<parallel>, #tpu.dimension_semantics<arbitrary>], iteration_bounds = array<i64: 1, 1>, scalar_prefetch = 0 : i64, scratch_operands = 1 : i64, tpu.core_type = #tpu.core_type<tc>, window_params = [{transform_indices = @transform_0, window_bounds = array<i64: 2, 8, 128>}, {transform_indices = @transform_1, window_bounds = array<i64: 2, 8, 128>}, {transform_indices = @transform_2, window_bounds = array<i64: 1, 2, 4>}]} {
    %c0_i32 = arith.constant 0 : i32
    %0 = arith.cmpi eq, %arg1, %c0_i32 : i32
    %1 = arith.extui %0 : i1 to i32
    %c0_i32_0 = arith.constant 0 : i32
    %2 = arith.cmpi ne, %1, %c0_i32_0 : i32
    scf.if %2 {
      %cst = arith.constant 0.000000e+00 : f32
      %16 = vector.broadcast %cst : f32 to vector<4x2x128xf32>
      %c0 = arith.constant 0 : index
      %c0_8 = arith.constant 0 : index
      %c0_9 = arith.constant 0 : index
      %17 = vector.load %arg5[%c0, %c0_8, %c0_9] : memref<4x2x128xf32, #tpu.memory_space<vmem>>, vector<4x2x128xf32>
      tpu.vector_store %arg5[%c0, %c0_8, %c0_9], %16 {strides = array<i32>} : memref<4x2x128xf32, #tpu.memory_space<vmem>>, vector<4x2x128xf32>,
    } else {
    }
    %c1_i32 = arith.constant 1 : i32
    %3 = arith.muli %arg0, %c1_i32 : i32
    %4 = arith.addi %3, %arg1 : i32
    %c8_i32 = arith.constant 8 : i32
    %5 = arith.muli %4, %c8_i32 : i32
    %c8_i32_1 = arith.constant 8 : i32
    %6 = arith.subi %c8_i32_1, %5 : i32
    %c8_i32_2 = arith.constant 8 : i32
    %7 = arith.cmpi sge, %6, %c8_i32_2 : i32
    %8 = arith.extui %7 : i1 to i32
    %c0_i32_3 = arith.constant 0 : i32
    %9 = arith.cmpi ne, %8, %c0_i32_3 : i32
    scf.if %9 {
      %c0 = arith.constant 0 : index
      %c0_8 = arith.constant 0 : index
      %c0_9 = arith.constant 0 : index
      %16 = vector.load %arg2[%c0, %c0_8, %c0_9] : memref<2x8x128xf32, #tpu.memory_space<vmem>>, vector<2x8x128xf32>
      %c0_10 = arith.constant 0 : index
      %c0_11 = arith.constant 0 : index
      %c0_12 = arith.constant 0 : index
      %17 = vector.load %arg3[%c0_10, %c0_11, %c0_12] : memref<2x8x128xf32, #tpu.memory_space<vmem>>, vector<2x8x128xf32>
      %18 = math.absf %16 : vector<2x8x128xf32>
      %cst = arith.constant 0.000000e+00 : f32
      %19 = vector.broadcast %cst : f32 to vector<2x8x128xf32>
      %20 = arith.subf %19, %18 : vector<2x8x128xf32>
      %21 = math.exp %20 : vector<2x8x128xf32>
      %cst_13 = arith.constant 0.000000e+00 : f32
      %22 = vector.broadcast %cst_13 : f32 to vector<2x8x128xf32>
      %23 = arith.maximumf %16, %22 : vector<2x8x128xf32>
      %24 = arith.mulf %16, %17 : vector<2x8x128xf32>
      %25 = arith.subf %23, %24 : vector<2x8x128xf32>
      %26 = math.log1p %21 : vector<2x8x128xf32>
      %27 = arith.addf %25, %26 : vector<2x8x128xf32>
      %cst_14 = arith.constant 1.000000e+00 : f32
      %28 = vector.broadcast %cst_14 : f32 to vector<2x8x128xf32>
      %29 = arith.addf %28, %21 : vector<2x8x128xf32>
      %30 = tpu.reciprocal %29 {approx = true} : vector<2x8x128xf32> -> vector<2x8x128xf32>
      %cst_15 = arith.constant 0.000000e+00 : f32
      %31 = vector.broadcast %cst_15 : f32 to vector<2x8x128xf32>
      %32 = arith.cmpf oge, %16, %31 : vector<2x8x128xf32>
      %33 = arith.mulf %21, %30 : vector<2x8x128xf32>
      %34 = arith.select %32, %30, %33 : vector<2x8x128xi1>, vector<2x8x128xf32>
      %c0_16 = arith.constant 0 : index
      %c0_17 = arith.constant 0 : index
      %c0_18 = arith.constant 0 : index
      %35 = vector.load %arg5[%c0_16, %c0_17, %c0_18] : memref<4x2x128xf32, #tpu.memory_space<vmem>>, vector<1x2x128xf32>
      %36 = vector.shape_cast %35 : vector<1x2x128xf32> to vector<2x128xf32>
      %cst_19 = arith.constant dense<0.000000e+00> : vector<2x128xf32>
      %37 = vector.multi_reduction <add>, %27, %cst_19 [1] : vector<2x8x128xf32> to vector<2x128xf32>
      %38 = arith.addf %36, %37 : vector<2x128xf32>
      %c0_20 = arith.constant 0 : index
      %c0_21 = arith.constant 0 : index
      %c0_22 = arith.constant 0 : index
      %39 = vector.load %arg5[%c0_20, %c0_21, %c0_22] : memref<4x2x128xf32, #tpu.memory_space<vmem>>, vector<1x2x128xf32>
      %40 = vector.shape_cast %39 : vector<1x2x128xf32> to vector<2x128xf32>
      %41 = vector.shape_cast %38 : vector<2x128xf32> to vector<1x2x128xf32>
      tpu.vector_store %arg5[%c0_20, %c0_21, %c0_22], %41 {strides = array<i32>} : memref<4x2x128xf32, #tpu.memory_space<vmem>>, vector<1x2x128xf32>,
      %c1 = arith.constant 1 : index
      %c0_23 = arith.constant 0 : index
      %c0_24 = arith.constant 0 : index
      %42 = vector.load %arg5[%c1, %c0_23, %c0_24] : memref<4x2x128xf32, #tpu.memory_space<vmem>>, vector<1x2x128xf32>
      %43 = vector.shape_cast %42 : vector<1x2x128xf32> to vector<2x128xf32>
      %44 = arith.mulf %34, %17 : vector<2x8x128xf32>
      %cst_25 = arith.constant dense<0.000000e+00> : vector<2x128xf32>
      %45 = vector.multi_reduction <add>, %44, %cst_25 [1] : vector<2x8x128xf32> to vector<2x128xf32>
      %46 = arith.addf %43, %45 : vector<2x128xf32>
      %c1_26 = arith.constant 1 : index
      %c0_27 = arith.constant 0 : index
      %c0_28 = arith.constant 0 : index
      %47 = vector.load %arg5[%c1_26, %c0_27, %c0_28] : memref<4x2x128xf32, #tpu.memory_space<vmem>>, vector<1x2x128xf32>
      %48 = vector.shape_cast %47 : vector<1x2x128xf32> to vector<2x128xf32>
      %49 = vector.shape_cast %46 : vector<2x128xf32> to vector<1x2x128xf32>
      tpu.vector_store %arg5[%c1_26, %c0_27, %c0_28], %49 {strides = array<i32>} : memref<4x2x128xf32, #tpu.memory_space<vmem>>, vector<1x2x128xf32>,
      %c2 = arith.constant 2 : index
      %c0_29 = arith.constant 0 : index
      %c0_30 = arith.constant 0 : index
      %50 = vector.load %arg5[%c2, %c0_29, %c0_30] : memref<4x2x128xf32, #tpu.memory_space<vmem>>, vector<1x2x128xf32>
      %51 = vector.shape_cast %50 : vector<1x2x128xf32> to vector<2x128xf32>
      %cst_31 = arith.constant dense<0.000000e+00> : vector<2x128xf32>
      %52 = vector.multi_reduction <add>, %34, %cst_31 [1] : vector<2x8x128xf32> to vector<2x128xf32>
      %53 = arith.addf %51, %52 : vector<2x128xf32>
      %c2_32 = arith.constant 2 : index
      %c0_33 = arith.constant 0 : index
      %c0_34 = arith.constant 0 : index
      %54 = vector.load %arg5[%c2_32, %c0_33, %c0_34] : memref<4x2x128xf32, #tpu.memory_space<vmem>>, vector<1x2x128xf32>
      %55 = vector.shape_cast %54 : vector<1x2x128xf32> to vector<2x128xf32>
      %56 = vector.shape_cast %53 : vector<2x128xf32> to vector<1x2x128xf32>
      tpu.vector_store %arg5[%c2_32, %c0_33, %c0_34], %56 {strides = array<i32>} : memref<4x2x128xf32, #tpu.memory_space<vmem>>, vector<1x2x128xf32>,
      %c3 = arith.constant 3 : index
      %c0_35 = arith.constant 0 : index
      %c0_36 = arith.constant 0 : index
      %57 = vector.load %arg5[%c3, %c0_35, %c0_36] : memref<4x2x128xf32, #tpu.memory_space<vmem>>, vector<1x2x128xf32>
      %58 = vector.shape_cast %57 : vector<1x2x128xf32> to vector<2x128xf32>
      %cst_37 = arith.constant dense<0.000000e+00> : vector<2x128xf32>
      %59 = vector.multi_reduction <add>, %17, %cst_37 [1] : vector<2x8x128xf32> to vector<2x128xf32>
      %60 = arith.addf %58, %59 : vector<2x128xf32>
      %c3_38 = arith.constant 3 : index
      %c0_39 = arith.constant 0 : index
      %c0_40 = arith.constant 0 : index
      %61 = vector.load %arg5[%c3_38, %c0_39, %c0_40] : memref<4x2x128xf32, #tpu.memory_space<vmem>>, vector<1x2x128xf32>
      %62 = vector.shape_cast %61 : vector<1x2x128xf32> to vector<2x128xf32>
      %63 = vector.shape_cast %60 : vector<2x128xf32> to vector<1x2x128xf32>
      tpu.vector_store %arg5[%c3_38, %c0_39, %c0_40], %63 {strides = array<i32>} : memref<4x2x128xf32, #tpu.memory_space<vmem>>, vector<1x2x128xf32>,
    } else {
    }
    %c8_i32_4 = arith.constant 8 : i32
    %10 = arith.cmpi slt, %6, %c8_i32_4 : i32
    %11 = arith.extui %10 : i1 to i32
    %c0_i32_5 = arith.constant 0 : i32
    %12 = arith.cmpi ne, %11, %c0_i32_5 : i32
    scf.if %12 {
      %16 = tpu.iota {dimensions = array<i32: 1>} : vector<1x8x1xi32>
      %c0 = arith.constant 0 : index
      %c0_8 = arith.constant 0 : index
      %c0_9 = arith.constant 0 : index
      %17 = vector.load %arg2[%c0, %c0_8, %c0_9] : memref<2x8x128xf32, #tpu.memory_space<vmem>>, vector<2x8x128xf32>
      %c0_10 = arith.constant 0 : index
      %c0_11 = arith.constant 0 : index
      %c0_12 = arith.constant 0 : index
      %18 = vector.load %arg3[%c0_10, %c0_11, %c0_12] : memref<2x8x128xf32, #tpu.memory_space<vmem>>, vector<2x8x128xf32>
      %c0_i32_13 = arith.constant 0 : i32
      %19 = arith.subi %6, %c0_i32_13 : i32
      %20 = vector.broadcast %19 : i32 to vector<1x8x1xi32>
      %21 = arith.cmpi slt, %16, %20 : vector<1x8x1xi32>
      %cst = arith.constant -1.000000e+04 : f32
      %22 = vector.shape_cast %21 : vector<1x8x1xi1> to vector<1x8x1xi1>
      %23 = vector.broadcast %22 : vector<1x8x1xi1> to vector<2x8x128xi1>
      %24 = vector.broadcast %cst : f32 to vector<2x8x128xf32>
      %25 = arith.select %23, %17, %24 : vector<2x8x128xi1>, vector<2x8x128xf32>
      %cst_14 = arith.constant 0.000000e+00 : f32
      %26 = vector.shape_cast %21 : vector<1x8x1xi1> to vector<1x8x1xi1>
      %27 = vector.broadcast %26 : vector<1x8x1xi1> to vector<2x8x128xi1>
      %28 = vector.broadcast %cst_14 : f32 to vector<2x8x128xf32>
      %29 = arith.select %27, %18, %28 : vector<2x8x128xi1>, vector<2x8x128xf32>
      %30 = math.absf %25 : vector<2x8x128xf32>
      %cst_15 = arith.constant 0.000000e+00 : f32
      %31 = vector.broadcast %cst_15 : f32 to vector<2x8x128xf32>
      %32 = arith.subf %31, %30 : vector<2x8x128xf32>
      %33 = math.exp %32 : vector<2x8x128xf32>
      %cst_16 = arith.constant 0.000000e+00 : f32
      %34 = vector.broadcast %cst_16 : f32 to vector<2x8x128xf32>
      %35 = arith.maximumf %25, %34 : vector<2x8x128xf32>
      %36 = arith.mulf %25, %29 : vector<2x8x128xf32>
      %37 = arith.subf %35, %36 : vector<2x8x128xf32>
      %38 = math.log1p %33 : vector<2x8x128xf32>
      %39 = arith.addf %37, %38 : vector<2x8x128xf32>
      %cst_17 = arith.constant 1.000000e+00 : f32
      %40 = vector.broadcast %cst_17 : f32 to vector<2x8x128xf32>
      %41 = arith.addf %40, %33 : vector<2x8x128xf32>
      %42 = tpu.reciprocal %41 {approx = true} : vector<2x8x128xf32> -> vector<2x8x128xf32>
      %cst_18 = arith.constant 0.000000e+00 : f32
      %43 = vector.broadcast %cst_18 : f32 to vector<2x8x128xf32>
      %44 = arith.cmpf oge, %25, %43 : vector<2x8x128xf32>
      %45 = arith.mulf %33, %42 : vector<2x8x128xf32>
      %46 = arith.select %44, %42, %45 : vector<2x8x128xi1>, vector<2x8x128xf32>
      %c0_19 = arith.constant 0 : index
      %c0_20 = arith.constant 0 : index
      %c0_21 = arith.constant 0 : index
      %47 = vector.load %arg5[%c0_19, %c0_20, %c0_21] : memref<4x2x128xf32, #tpu.memory_space<vmem>>, vector<1x2x128xf32>
      %48 = vector.shape_cast %47 : vector<1x2x128xf32> to vector<2x128xf32>
      %cst_22 = arith.constant dense<0.000000e+00> : vector<2x128xf32>
      %49 = vector.multi_reduction <add>, %39, %cst_22 [1] : vector<2x8x128xf32> to vector<2x128xf32>
      %50 = arith.addf %48, %49 : vector<2x128xf32>
      %c0_23 = arith.constant 0 : index
      %c0_24 = arith.constant 0 : index
      %c0_25 = arith.constant 0 : index
      %51 = vector.load %arg5[%c0_23, %c0_24, %c0_25] : memref<4x2x128xf32, #tpu.memory_space<vmem>>, vector<1x2x128xf32>
      %52 = vector.shape_cast %51 : vector<1x2x128xf32> to vector<2x128xf32>
      %53 = vector.shape_cast %50 : vector<2x128xf32> to vector<1x2x128xf32>
      tpu.vector_store %arg5[%c0_23, %c0_24, %c0_25], %53 {strides = array<i32>} : memref<4x2x128xf32, #tpu.memory_space<vmem>>, vector<1x2x128xf32>,
      %c1 = arith.constant 1 : index
      %c0_26 = arith.constant 0 : index
      %c0_27 = arith.constant 0 : index
      %54 = vector.load %arg5[%c1, %c0_26, %c0_27] : memref<4x2x128xf32, #tpu.memory_space<vmem>>, vector<1x2x128xf32>
      %55 = vector.shape_cast %54 : vector<1x2x128xf32> to vector<2x128xf32>
      %56 = arith.mulf %46, %29 : vector<2x8x128xf32>
      %cst_28 = arith.constant dense<0.000000e+00> : vector<2x128xf32>
      %57 = vector.multi_reduction <add>, %56, %cst_28 [1] : vector<2x8x128xf32> to vector<2x128xf32>
      %58 = arith.addf %55, %57 : vector<2x128xf32>
      %c1_29 = arith.constant 1 : index
      %c0_30 = arith.constant 0 : index
      %c0_31 = arith.constant 0 : index
      %59 = vector.load %arg5[%c1_29, %c0_30, %c0_31] : memref<4x2x128xf32, #tpu.memory_space<vmem>>, vector<1x2x128xf32>
      %60 = vector.shape_cast %59 : vector<1x2x128xf32> to vector<2x128xf32>
      %61 = vector.shape_cast %58 : vector<2x128xf32> to vector<1x2x128xf32>
      tpu.vector_store %arg5[%c1_29, %c0_30, %c0_31], %61 {strides = array<i32>} : memref<4x2x128xf32, #tpu.memory_space<vmem>>, vector<1x2x128xf32>,
      %c2 = arith.constant 2 : index
      %c0_32 = arith.constant 0 : index
      %c0_33 = arith.constant 0 : index
      %62 = vector.load %arg5[%c2, %c0_32, %c0_33] : memref<4x2x128xf32, #tpu.memory_space<vmem>>, vector<1x2x128xf32>
      %63 = vector.shape_cast %62 : vector<1x2x128xf32> to vector<2x128xf32>
      %cst_34 = arith.constant dense<0.000000e+00> : vector<2x128xf32>
      %64 = vector.multi_reduction <add>, %46, %cst_34 [1] : vector<2x8x128xf32> to vector<2x128xf32>
      %65 = arith.addf %63, %64 : vector<2x128xf32>
      %c2_35 = arith.constant 2 : index
      %c0_36 = arith.constant 0 : index
      %c0_37 = arith.constant 0 : index
      %66 = vector.load %arg5[%c2_35, %c0_36, %c0_37] : memref<4x2x128xf32, #tpu.memory_space<vmem>>, vector<1x2x128xf32>
      %67 = vector.shape_cast %66 : vector<1x2x128xf32> to vector<2x128xf32>
      %68 = vector.shape_cast %65 : vector<2x128xf32> to vector<1x2x128xf32>
      tpu.vector_store %arg5[%c2_35, %c0_36, %c0_37], %68 {strides = array<i32>} : memref<4x2x128xf32, #tpu.memory_space<vmem>>, vector<1x2x128xf32>,
      %c3 = arith.constant 3 : index
      %c0_38 = arith.constant 0 : index
      %c0_39 = arith.constant 0 : index
      %69 = vector.load %arg5[%c3, %c0_38, %c0_39] : memref<4x2x128xf32, #tpu.memory_space<vmem>>, vector<1x2x128xf32>
      %70 = vector.shape_cast %69 : vector<1x2x128xf32> to vector<2x128xf32>
      %cst_40 = arith.constant dense<0.000000e+00> : vector<2x128xf32>
      %71 = vector.multi_reduction <add>, %29, %cst_40 [1] : vector<2x8x128xf32> to vector<2x128xf32>
      %72 = arith.addf %70, %71 : vector<2x128xf32>
      %c3_41 = arith.constant 3 : index
      %c0_42 = arith.constant 0 : index
      %c0_43 = arith.constant 0 : index
      %73 = vector.load %arg5[%c3_41, %c0_42, %c0_43] : memref<4x2x128xf32, #tpu.memory_space<vmem>>, vector<1x2x128xf32>
      %74 = vector.shape_cast %73 : vector<1x2x128xf32> to vector<2x128xf32>
      %75 = vector.shape_cast %72 : vector<2x128xf32> to vector<1x2x128xf32>
      tpu.vector_store %arg5[%c3_41, %c0_42, %c0_43], %75 {strides = array<i32>} : memref<4x2x128xf32, #tpu.memory_space<vmem>>, vector<1x2x128xf32>,
    } else {
    }
    %c0_i32_6 = arith.constant 0 : i32
    %13 = arith.cmpi eq, %arg1, %c0_i32_6 : i32
    %14 = arith.extui %13 : i1 to i32
    %c0_i32_7 = arith.constant 0 : i32
    %15 = arith.cmpi ne, %14, %c0_i32_7 : i32
    scf.if %15 {
      %16 = tpu.iota {dimensions = array<i32: 1>} : vector<1x4xi32>
      %c0 = arith.constant 0 : index
      %c0_8 = arith.constant 0 : index
      %c0_9 = arith.constant 0 : index
      %17 = vector.load %arg5[%c0, %c0_8, %c0_9] : memref<4x2x128xf32, #tpu.memory_space<vmem>>, vector<1x2x128xf32>
      %18 = vector.shape_cast %17 : vector<1x2x128xf32> to vector<2x128xf32>
      %cst = arith.constant dense<0.000000e+00> : vector<2xf32>
      %19 = vector.multi_reduction <add>, %18, %cst [1] : vector<2x128xf32> to vector<2xf32>
      %20 = vector.shape_cast %19 : vector<2xf32> to vector<2x1xf32>
      %c1 = arith.constant 1 : index
      %c0_10 = arith.constant 0 : index
      %c0_11 = arith.constant 0 : index
      %21 = vector.load %arg5[%c1, %c0_10, %c0_11] : memref<4x2x128xf32, #tpu.memory_space<vmem>>, vector<1x2x128xf32>
      %22 = vector.shape_cast %21 : vector<1x2x128xf32> to vector<2x128xf32>
      %cst_12 = arith.constant dense<0.000000e+00> : vector<2xf32>
      %23 = vector.multi_reduction <add>, %22, %cst_12 [1] : vector<2x128xf32> to vector<2xf32>
      %24 = vector.shape_cast %23 : vector<2xf32> to vector<2x1xf32>
      %c2 = arith.constant 2 : index
      %c0_13 = arith.constant 0 : index
      %c0_14 = arith.constant 0 : index
      %25 = vector.load %arg5[%c2, %c0_13, %c0_14] : memref<4x2x128xf32, #tpu.memory_space<vmem>>, vector<1x2x128xf32>
      %26 = vector.shape_cast %25 : vector<1x2x128xf32> to vector<2x128xf32>
      %cst_15 = arith.constant dense<0.000000e+00> : vector<2xf32>
      %27 = vector.multi_reduction <add>, %26, %cst_15 [1] : vector<2x128xf32> to vector<2xf32>
      %28 = vector.shape_cast %27 : vector<2xf32> to vector<2x1xf32>
      %c3 = arith.constant 3 : index
      %c0_16 = arith.constant 0 : index
      %c0_17 = arith.constant 0 : index
      %29 = vector.load %arg5[%c3, %c0_16, %c0_17] : memref<4x2x128xf32, #tpu.memory_space<vmem>>, vector<1x2x128xf32>
      %30 = vector.shape_cast %29 : vector<1x2x128xf32> to vector<2x128xf32>
      %cst_18 = arith.constant dense<0.000000e+00> : vector<2xf32>
      %31 = vector.multi_reduction <add>, %30, %cst_18 [1] : vector<2x128xf32> to vector<2xf32>
      %32 = vector.shape_cast %31 : vector<2xf32> to vector<2x1xf32>
      %c0_i32_19 = arith.constant 0 : i32
      %33 = vector.broadcast %c0_i32_19 : i32 to vector<1x4xi32>
      %34 = arith.cmpi eq, %16, %33 : vector<1x4xi32>
      %cst_20 = arith.constant 0.000000e+00 : f32
      %35 = vector.shape_cast %34 : vector<1x4xi1> to vector<1x4xi1>
      %36 = vector.broadcast %35 : vector<1x4xi1> to vector<2x4xi1>
      %37 = vector.shape_cast %20 : vector<2x1xf32> to vector<2x1xf32>
      %38 = vector.broadcast %37 : vector<2x1xf32> to vector<2x4xf32>
      %39 = vector.broadcast %cst_20 : f32 to vector<2x4xf32>
      %40 = arith.select %36, %38, %39 : vector<2x4xi1>, vector<2x4xf32>
      %c1_i32_21 = arith.constant 1 : i32
      %41 = vector.broadcast %c1_i32_21 : i32 to vector<1x4xi32>
      %42 = arith.cmpi eq, %16, %41 : vector<1x4xi32>
      %cst_22 = arith.constant 0.000000e+00 : f32
      %43 = vector.shape_cast %42 : vector<1x4xi1> to vector<1x4xi1>
      %44 = vector.broadcast %43 : vector<1x4xi1> to vector<2x4xi1>
      %45 = vector.shape_cast %24 : vector<2x1xf32> to vector<2x1xf32>
      %46 = vector.broadcast %45 : vector<2x1xf32> to vector<2x4xf32>
      %47 = vector.broadcast %cst_22 : f32 to vector<2x4xf32>
      %48 = arith.select %44, %46, %47 : vector<2x4xi1>, vector<2x4xf32>
      %49 = arith.addf %40, %48 : vector<2x4xf32>
      %c2_i32 = arith.constant 2 : i32
      %50 = vector.broadcast %c2_i32 : i32 to vector<1x4xi32>
      %51 = arith.cmpi eq, %16, %50 : vector<1x4xi32>
      %cst_23 = arith.constant 0.000000e+00 : f32
      %52 = vector.shape_cast %51 : vector<1x4xi1> to vector<1x4xi1>
      %53 = vector.broadcast %52 : vector<1x4xi1> to vector<2x4xi1>
      %54 = vector.shape_cast %28 : vector<2x1xf32> to vector<2x1xf32>
      %55 = vector.broadcast %54 : vector<2x1xf32> to vector<2x4xf32>
      %56 = vector.broadcast %cst_23 : f32 to vector<2x4xf32>
      %57 = arith.select %53, %55, %56 : vector<2x4xi1>, vector<2x4xf32>
      %58 = arith.addf %49, %57 : vector<2x4xf32>
      %c3_i32 = arith.constant 3 : i32
      %59 = vector.broadcast %c3_i32 : i32 to vector<1x4xi32>
      %60 = arith.cmpi eq, %16, %59 : vector<1x4xi32>
      %cst_24 = arith.constant 0.000000e+00 : f32
      %61 = vector.shape_cast %60 : vector<1x4xi1> to vector<1x4xi1>
      %62 = vector.broadcast %61 : vector<1x4xi1> to vector<2x4xi1>
      %63 = vector.shape_cast %32 : vector<2x1xf32> to vector<2x1xf32>
      %64 = vector.broadcast %63 : vector<2x1xf32> to vector<2x4xf32>
      %65 = vector.broadcast %cst_24 : f32 to vector<2x4xf32>
      %66 = arith.select %62, %64, %65 : vector<2x4xi1>, vector<2x4xf32>
      %67 = arith.addf %58, %66 : vector<2x4xf32>
      %68 = vector.shape_cast %67 : vector<2x4xf32> to vector<1x2x4xf32>
      %c0_25 = arith.constant 0 : index
      %c0_26 = arith.constant 0 : index
      %c0_27 = arith.constant 0 : index
      %69 = vector.load %arg4[%c0_25, %c0_26, %c0_27] : memref<1x2x4xf32, #tpu.memory_space<vmem>>, vector<1x2x4xf32>
      tpu.vector_store %arg4[%c0_25, %c0_26, %c0_27], %68 {strides = array<i32>} : memref<1x2x4xf32, #tpu.memory_space<vmem>>, vector<1x2x4xf32>,
    } else {
    }
    return
  }
  func.func @transform_0(%arg0: i32, %arg1: i32) -> (i32, i32, i32) {
    %c1_i32 = arith.constant 1 : i32
    %0 = arith.muli %arg0, %c1_i32 : i32
    %1 = arith.addi %0, %arg1 : i32
    %c0_i32 = arith.constant 0 : i32
    %c0_i32_0 = arith.constant 0 : i32
    %c0_i32_1 = arith.constant 0 : i32
    return %c0_i32, %1, %c0_i32_0 : i32, i32, i32
  }
  func.func @transform_1(%arg0: i32, %arg1: i32) -> (i32, i32, i32) {
    %c1_i32 = arith.constant 1 : i32
    %0 = arith.muli %arg0, %c1_i32 : i32
    %1 = arith.addi %0, %arg1 : i32
    %c0_i32 = arith.constant 0 : i32
    %c0_i32_0 = arith.constant 0 : i32
    %c0_i32_1 = arith.constant 0 : i32
    return %c0_i32, %1, %c0_i32_0 : i32, i32, i32
  }
  func.func @transform_2(%arg0: i32, %arg1: i32) -> (i32, i32, i32) {
    %c0_i32 = arith.constant 0 : i32
    %c0_i32_0 = arith.constant 0 : i32
    %c0_i32_1 = arith.constant 0 : i32
    return %arg0, %c0_i32, %c0_i32_0 : i32, i32, i32
  }
}

</mosaic_0001>

<bundles_post_ra>
// kernel: tpu_custom_call.1
= control target key start
LH: loop header
LB: loop body
LE: loop exit
PB: predicated region body
PF: predicated region fallthrough
CT: control target
= control target key end

     0   :  { %7 = vsyncpa [#allocation4], 0  ;;  %s541_s0 = inlined_call_operand.hbm [shape: f32[2,8,128], index: 0, kind: input, shape index: {}]   ;;  %s542_s1 = inlined_call_operand.hbm [shape: f32[2,8,128], index: 1, kind: input, shape index: {}]   ;;  %s543_s2 = inlined_call_operand.hbm [shape: f32[1,2,4], index: 2, kind: output, shape index: {}]  }
   0x1   :  { %8 = vsyncpa [#allocation7], 0 }
   0x2   :  { %9 = vsyncpa [#allocation5], 0  ;;  %s483_s9 = smov [#allocation3]  }
   0x3   :  { %s18_s10 = sshll.u32 %s483_s9, 4  ;;  %s19_s10 = int_to_ptr.vmem [resolvable:$true] %s18_s10 }
   0x4   :  { %s425_s11 = scalar_lea.vmem %s19_s10, 256  ;;  %p430_p1 = scmp.lt.s32.totalorder %s19_s10, %s19_s10 }
   0x5   :  { %p426_p0 = scmp.ne.s32.totalorder %s19_s10, %s425_s11  ;;  %p431_p2 = scmp.lt.s32.totalorder %s425_s11, %s425_s11 }
   0x7   :  { %p432_p3 = por %p431_p2, %p430_p1 }
   0x9   :  { %p433_p4 = pnand %p432_p3, %p426_p0 }
   0xb   :  { %436 = shalt.err (!%p433_p4)
}
   0xc   :  { %s484_s12 = smov 128   ;;  %s485_s13 = smov 8  }
   0xd   :  { %24 = dma.hbm_to_vmem [thread:$0]  %s541_s0, 256, %s19_s10, [#allocation4], %s484_s12, %s484_s12, %s485_s13  }
   0xe   :  { %s486_s16 = smov [#allocation6]  }
   0xf   :  { %s33_s17 = sshll.u32 %s486_s16, 4  ;;  %s34_s17 = int_to_ptr.vmem [resolvable:$true] %s33_s17 }
  0x10   :  { %s445_s18 = scalar_lea.vmem %s34_s17, 256  ;;  %p450_p6 = scmp.lt.s32.totalorder %s34_s17, %s34_s17 }
  0x11   :  { %p446_p5 = scmp.ne.s32.totalorder %s34_s17, %s445_s18  ;;  %p451_p7 = scmp.lt.s32.totalorder %s445_s18, %s445_s18 }
  0x13   :  { %p452_p8 = por %p451_p7, %p450_p6 }
  0x15   :  { %p453_p9 = pnand %p452_p8, %p446_p5 }
  0x17   :  { %456 = shalt.err (!%p453_p9)
}
  0x18   :  { %39 = dma.hbm_to_vmem [thread:$0]  %s542_s1, 256, %s34_s17, [#allocation7], %s484_s12, %s484_s12, %s485_s13  }
  0x19   :  { %477 = dma.done.wait [#allocation4], 256  }
  0x1a   :  { %478 = vsyncadd [#allocation4], 4294967040 }
  0x1b   :  { %479 = dma.done.wait [#allocation7], 256  }
  0x1c   :  { %480 = vsyncadd [#allocation7], 4294967040  ;;  %v487_v0 = vmov 0.0   ;;  %v510_v1 = vld [vmem:[#allocation3] sm:$0xff]  ;;  %v512_v2 = vld [vmem:[#allocation3 + $0x8] sm:$0xff]  ;;  %vm126_vm0 = vcmask 1041409  }
  0x1d   :  { %52 = vst [vmem:[#allocation2] sm:$0x3] %v487_v0  ;;  %53 = vst [vmem:[#allocation2 + $0x2] sm:$0x3] %v487_v0  ;;  %v67_v3 = vand.u32 2147483647, %v510_v1 }
  0x1e   :  { %54 = vst [vmem:[#allocation2 + $0x4] sm:$0x3] %v487_v0  ;;  %55 = vst [vmem:[#allocation2 + $0x6] sm:$0x3] %v487_v0  ;;  %v68_v4 = vand.u32 2147483647, %v512_v2 }
  0x1f   :  { %v516_v5 = vld [vmem:[#allocation6] sm:$0xff]  ;;  %v518_v6 = vld [vmem:[#allocation6 + $0x8] sm:$0xff]  ;;  %v69_v7 = vsub.f32 0.0, %v67_v3  ;;  %v75_v33 = vmax.f32 %v510_v1, 0.0  ;;  %v76_v37 = vmax.f32 %v512_v2, 0.0  ;;  %vm105_vm3 = vcmp.ge.f32.partialorder %v510_v1, 0.0 }
  0x20   :  { %v70_v8 = vsub.f32 0.0, %v68_v4  ;;  %v175_v9 = vrot.slane %v516_v5, 4  ;;  %v181_v10 = vrot.slane %v518_v6, 4  ;;  %v77_v34 = vmul.f32 %v516_v5, %v510_v1  ;;  %s488_s0 = smov [#allocation8]  }
  0x21   :  { %v71_v11 = vmul.f32 1.442695, %v69_v7  ;;  %v78_v38 = vmul.f32 %v518_v6, %v512_v2  ;;  %vm106_vm4 = vcmp.ge.f32.partialorder %v512_v2, 0.0  ;;  %vm343_vm5 = vcmask 1041408   ;;  %s389_s1 = sshll.u32 %s488_s0, 4  ;;  %s390_s1 = int_to_ptr.vmem [resolvable:$true] %s389_s1 }
  0x22   :  { %v73_v12 = vmul.f32 1.442695, %v70_v8  ;;  %v176_v13 = vadd.f32 %v175_v9, %v516_v5  ;;  %v182_v14 = vadd.f32 %v181_v10, %v518_v6  ;;  %v79_v42 = vsub.f32 %v75_v33, %v77_v34  ;;  %s457_s21 = scalar_lea.vmem %s390_s1, 32  ;;  %p462_p11 = scmp.lt.s32.totalorder %s390_s1, %s390_s1 }
  0x23   :  { %405 = vpow2.f32 %v71_v11  ;;  %v80_v45 = vsub.f32 %v76_v37, %v78_v38  ;;  %vm381_vm10 = vcmask 25600   ;;  %p458_p10 = scmp.ne.s32.totalorder %s390_s1, %s457_s21  ;;  %p463_p12 = scmp.lt.s32.totalorder %s457_s21, %s457_s21 }
  0x24   :  { %407 = vpow2.f32 %v73_v12  ;;  %v177_v15 = vrot.slane %v176_v13, 2  ;;  %v183_v16 = vrot.slane %v182_v14, 2 }
  0x25   :  { %v174_v21 = vld [vmem:[#allocation2 + $0x6] sm:$0x3]  ;;  %p464_p13 = por %p463_p12, %p462_p11 }
  0x26   :  { %v178_v17 = vadd.f32 %v177_v15, %v176_v13  ;;  %v184_v18 = vadd.f32 %v183_v16, %v182_v14 }
  0x27   :  { %p465_p0 = pnand %p464_p13, %p458_p10 }
  0x28   :  { %v179_v19 = vrot.slane %v178_v17, 1  ;;  %v185_v20 = vrot.slane %v184_v18, 1 }
  0x2a   :  { %v180_v22 = vadd.f32 %v179_v19, %v178_v17  ;;  %v186_v23 = vadd.f32 %v185_v20, %v184_v18 }
  0x2c   :  { %v189_v24 = vsel %vm126_vm0, %v186_v23, %v180_v22 }
  0x2d   :  { %v191_v25 = vadd.f32 %v189_v24, %v174_v21 }
  0x2f   :  { %192 = vst [vmem:[#allocation2 + $0x6] sm:$0x3] %v191_v25 }
  0x30   :  { %v406_v26 = vpop.eup %405 }
  0x31   :  { %v408_v27 = vpop.eup %407  ;;  %v81_v28 = vadd.f32 1.0, %v406_v26  ;;  %v84_v30 = vmul.f32 -0.5, %v406_v26  ;;  %v87_v35 = vand.u32 2147483647, %v406_v26 }
  0x32   :  { %v90_v29 = vadd.f32 1.0, %v408_v27  ;;  %v93_v31 = vmul.f32 -0.5, %v408_v27  ;;  %v96_v39 = vand.u32 2147483647, %v408_v27 }
  0x33   :  { %409 = vlog2.f32 %v81_v28  ;;  %v85_v32 = vadd.f32 1.0, %v84_v30  ;;  %vm88_vm1 = vcmp.lt.f32.partialorder %v87_v35, 0.0004427343  ;;  %v132_v35 = vld [vmem:[#allocation2 + $0x2] sm:$0x3] }
  0x34   :  { %411 = vlog2.f32 %v90_v29  ;;  %v94_v36 = vadd.f32 1.0, %v93_v31  ;;  %vm97_vm2 = vcmp.lt.f32.partialorder %v96_v39, 0.0004427343 }
  0x35   :  { %413 = vrcp.f32 %v81_v28  ;;  %v86_v40 = vmul.f32 %v406_v26, %v85_v32 }
  0x36   :  { %415 = vrcp.f32 %v90_v29  ;;  %v95_v43 = vmul.f32 %v408_v27, %v94_v36  ;;  %v154_v29 = vld [vmem:[#allocation2 + $0x4] sm:$0x3] }
  0x40   :  { %v410_v41 = vpop.eup %409 }
  0x41   :  { %v412_v44 = vpop.eup %411  ;;  %v83_v46 = vmul.f32 0.6931472, %v410_v41 }
  0x42   :  { %v414_v47 = vpop.eup %413  ;;  %v92_v48 = vmul.f32 0.6931472, %v412_v44 }
  0x43   :  { %v416_v49 = vpop.eup %415  ;;  %v89_v50 = vsel %vm88_vm1, %v86_v40, %v83_v46  ;;  %v107_v51 = vmul.f32 %v414_v47, %v406_v26 }
  0x44   :  { %v98_v52 = vsel %vm97_vm2, %v95_v43, %v92_v48  ;;  %v99_v53 = vadd.f32 %v89_v50, %v79_v42  ;;  %v108_v54 = vmul.f32 %v416_v49, %v408_v27  ;;  %v111_v27 = vld [vmem:[#allocation2] sm:$0x3]  ;;  %v358_v43 = vld [vmem:[#allocation2 + $0x6] sm:$0x3] }
  0x45   :  { %v100_v55 = vadd.f32 %v98_v52, %v80_v45  ;;  %v109_v56 = vsel %vm105_vm3, %v414_v47, %v107_v51  ;;  %v359_v48 = vsel %vm343_vm5, %v358_v43, 0.0 }
  0x46   :  { %v112_v57 = vrot.slane %v99_v53, 4  ;;  %v110_v58 = vsel %vm106_vm4, %v416_v49, %v108_v54  ;;  %v155_v59 = vrot.slane %v109_v56, 4  ;;  %v133_v60 = vmul.f32 %v109_v56, %v516_v5 }
  0x47   :  { %v118_v61 = vrot.slane %v100_v55, 4  ;;  %v161_v62 = vrot.slane %v110_v58, 4  ;;  %v134_v63 = vmul.f32 %v110_v58, %v518_v6  ;;  %v340_v49 = vlaneseq }
  0x48   :  { %v113_v0 = vadd.f32 %v112_v57, %v99_v53  ;;  %v156_v1 = vadd.f32 %v155_v59, %v109_v56  ;;  %v135_v3 = vrot.slane %v133_v60, 4 }
  0x49   :  { %v119_v4 = vadd.f32 %v118_v61, %v100_v55  ;;  %v162_v2 = vadd.f32 %v161_v62, %v110_v58  ;;  %v141_v7 = vrot.slane %v134_v63, 4  ;;  %v341_v50 = vand.u32 127, %v340_v49 }
  0x4a   :  { %v114_v8 = vrot.slane %v113_v0, 2  ;;  %v157_v9 = vrot.slane %v156_v1, 2  ;;  %v136_v10 = vadd.f32 %v135_v3, %v133_v60 }
  0x4b   :  { %v120_v11 = vrot.slane %v119_v4, 2  ;;  %v163_v12 = vrot.slane %v162_v2, 2  ;;  %v142_v13 = vadd.f32 %v141_v7, %v134_v63  ;;  %vm362_vm6 = vcmp.eq.s32.totalorder %v341_v50, 0 }
  0x4c   :  { %v115_v14 = vadd.f32 %v114_v8, %v113_v0  ;;  %v158_v15 = vadd.f32 %v157_v9, %v156_v1  ;;  %v137_v16 = vrot.slane %v136_v10, 2  ;;  %vm366_vm7 = vcmp.eq.s32.totalorder %v341_v50, 1 }
  0x4d   :  { %v121_v5 = vadd.f32 %v120_v11, %v119_v4  ;;  %v164_v17 = vadd.f32 %v163_v12, %v162_v2  ;;  %v143_v18 = vrot.slane %v142_v13, 2  ;;  %vm371_vm8 = vcmp.eq.s32.totalorder %v341_v50, 2 }
  0x4e   :  { %v116_v19 = vrot.slane %v115_v14, 1  ;;  %v159_v6 = vrot.slane %v158_v15, 1  ;;  %v138_v20 = vadd.f32 %v137_v16, %v136_v10  ;;  %vm376_vm9 = vcmp.eq.s32.totalorder %v341_v50, 3 }
  0x4f   :  { %v122_v21 = vrot.slane %v121_v5, 1  ;;  %v165_v22 = vrot.slane %v164_v17, 1  ;;  %v144_v23 = vadd.f32 %v143_v18, %v142_v13 }
  0x50   :  { %v117_v24 = vadd.f32 %v116_v19, %v115_v14  ;;  %v160_v25 = vadd.f32 %v159_v6, %v158_v15  ;;  %v139_v26 = vrot.slane %v138_v20, 1 }
  0x51   :  { %v123_v28 = vadd.f32 %v122_v21, %v121_v5  ;;  %v166_v30 = vadd.f32 %v165_v22, %v164_v17  ;;  %v145_v31 = vrot.slane %v144_v23, 1 }
  0x52   :  { %v140_v32 = vadd.f32 %v139_v26, %v138_v20 }
  0x53   :  { %v127_v33 = vsel %vm126_vm0, %v123_v28, %v117_v24  ;;  %v169_v34 = vsel %vm126_vm0, %v166_v30, %v160_v25  ;;  %v146_v36 = vadd.f32 %v145_v31, %v144_v23 }
  0x54   :  { %v129_v37 = vadd.f32 %v127_v33, %v111_v27  ;;  %v171_v38 = vadd.f32 %v169_v34, %v154_v29 }
  0x55   :  { %v149_v39 = vsel %vm126_vm0, %v146_v36, %v140_v32 }
  0x56   :  { %130 = vst [vmem:[#allocation2] sm:$0x3] %v129_v37  ;;  %172 = vst [vmem:[#allocation2 + $0x4] sm:$0x3] %v171_v38  ;;  %v151_v40 = vadd.f32 %v149_v39, %v132_v35 }
  0x58   :  { %152 = vst [vmem:[#allocation2 + $0x2] sm:$0x3] %v151_v40 }
  0x5d   :  { %v342_v41 = vld [vmem:[#allocation2] sm:$0x3]  ;;  %v353_v42 = vld [vmem:[#allocation2 + $0x4] sm:$0x3] }
  0x5e   :  { %v344_v44 = vsel %vm343_vm5, %v342_v41, 0.0  ;;  %v354_v45 = vsel %vm343_vm5, %v353_v42, 0.0 }
  0x5f   :  { %345 = vadd.xlane.f32.xlu0 %v344_v44  ;;  %355 = vadd.xlane.f32.xlu1 %v354_v45  ;;  %v348_v46 = vld [vmem:[#allocation2 + $0x2] sm:$0x3] }
  0x60   :  { %v349_v47 = vsel %vm343_vm5, %v348_v46, 0.0 }
  0x63   :  { %350 = vadd.xlane.f32.xlu0 %v349_v47  ;;  %360 = vadd.xlane.f32.xlu1 %v359_v48 }
  0xe8   :  { %v346_v51 = vpop.xlane.xlu0 %345  ;;  %v356_v52 = vpop.xlane.xlu1 %355 }
  0xe9   :  { %v365_v55 = vsel %vm362_vm6, %v346_v51, 0.0  ;;  %v374_v58 = vsel %vm371_vm8, %v356_v52, 0.0 }
  0xec   :  { %v351_v53 = vpop.xlane.xlu0 %350  ;;  %v361_v54 = vpop.xlane.xlu1 %360 }
  0xed   :  { %v369_v56 = vsel %vm366_vm7, %v351_v53, 0.0  ;;  %v379_v59 = vsel %vm376_vm9, %v361_v54, 0.0 }
  0xee   :  { %v370_v57 = vadd.f32 %v369_v56, %v365_v55 }
  0xf0   :  { %v375_v60 = vadd.f32 %v374_v58, %v370_v57 }
  0xf2   :  { %v380_v61 = vadd.f32 %v379_v59, %v375_v60 }
  0xf4   :  { %382 = vst.msk [vmem:[#allocation8] sm:$0x3] %vm381_vm10, %v380_v61 }
  0xf5   :  { %468 = shalt.err (!%p465_p0)
}
  0xf6   :  { %392 = dma.vmem_to_hbm [thread:$0]  %s390_s1, 32, %s543_s2, [#allocation5]  }
  0xf7   :  { %481 = dma.done.wait [#allocation5], 32  }
  0xf8   :  { %482 = vsyncadd [#allocation5], 4294967264 }
  0xf9   :  { %396 = vsyncpa [#allocation4], 1 }
  0xfa   :  { %397 = vsyncpa [#allocation7], 1 }
  0xfb   :  { %398 = vsyncpa [#allocation5], 1 }

</bundles_post_ra>
